<compile_context>
chip_gen: v5e
topology: v5e:2x2
jax: 0.10.0
libtpu: 0.0.40
codegen_flags: <defaults>
</compile_context>

<pallas_src>
import functools
import math

import jax
import jax.numpy as jnp
from jax.experimental import pallas as pl
from jax.experimental.pallas import tpu as pltpu

# sigma = softplus(0) + 1e-5 is a compile-time constant because ACNet.forward()
# rebuilds logstd = nn.Parameter(torch.zeros(n_actions)) on every call.
_SIGMA = math.log(2.0) + 1e-5
# Constant part of the Normal log-density: -log(sigma) - 0.5*log(2*pi).
_LOGP_CONST = -math.log(_SIGMA) - 0.5 * math.log(2.0 * math.pi)


def _round_up(n, m):
    return ((n + m - 1) // m) * m


def _acnet_kernel(x_ref, eps_ref, w12_ref, wm_ref, bias_ref, out_ref,
                  *, state_size, hidden_size):
    S, H = state_size, hidden_size

    x = x_ref[...]                                   # (BM, S)
    w1 = w12_ref[0:S, :]                             # (S, H)  static, sublane-aligned slice
    w2 = w12_ref[S:S + H, :]                         # (H, H)
    b1 = bias_ref[0:1, 0:H]                          # (1, H)
    b2 = bias_ref[1:2, 0:H]                          # (1, H)
    bm = bias_ref[2:3, :]                            # (1, LANES)

    # policy MLP (A2C_policy.lp): Linear -> ReLU -> Linear -> ReLU
    h1 = jnp.maximum(jnp.dot(x, w1, preferred_element_type=jnp.float32) + b1, 0.0)
    h2 = jnp.maximum(jnp.dot(h1, w2, preferred_element_type=jnp.float32) + b2, 0.0)

    # mean head + tanh (lane-padded to LANES columns; padded columns stay exactly 0)
    mu = jnp.tanh(jnp.dot(h2, wm_ref[...], preferred_element_type=jnp.float32) + bm)

    # Normal(mu, sigma): sample + log_prob with sigma constant-folded.
    # NOTE: log_prob uses (action - mu) == sigma * eps; if the action is ever
    # clamped/modified downstream this simplification must be dropped.
    eps = eps_ref[...]                               # (BM, LANES)
    action = mu + _SIGMA * eps
    log_p = -0.5 * (eps * eps) + _LOGP_CONST

    out_ref[0, :, :] = action                        # full-lane, unmasked stores
    out_ref[1, :, :] = log_p


def acnet_forward_batched(x, params, eps, *, block_rows=128):
    """Batched ACNet forward: x (B, S), eps (B, A) standard-normal noise.
    Returns (action, log_probs), each (B, A) float32 (per-row identical to act())."""
    w1, b1, w2, b2, wm, bm = params
    x = x.astype(jnp.float32)
    B, S = x.shape
    H = w1.shape[1]
    A = wm.shape[1]

    LANES = _round_up(max(A, H), 128)        # lane-dense padded action/bias width
    BM = min(block_rows, _round_up(B, 8))    # rows per grid step (sublane aligned)
    B_pad = _round_up(B, BM)

    # ---- padded / packed operands (wrapper-side layout plumbing, not compute) ----
    x_pad = jnp.zeros((B_pad, S), jnp.float32).at[:B, :].set(x)
    eps_pad = jnp.zeros((B_pad, LANES), jnp.float32).at[:B, :A].set(
        eps.astype(jnp.float32))

    w12 = jnp.concatenate([w1, w2], axis=0).astype(jnp.float32)          # (S+H, H)
    wm_pad = jnp.zeros((H, LANES), jnp.float32).at[:, :A].set(
        wm.astype(jnp.float32))                                          # (H, LANES)
    bias = (jnp.zeros((3, LANES), jnp.float32)
            .at[0, :H].set(b1.reshape(-1).astype(jnp.float32))
            .at[1, :H].set(b2.reshape(-1).astype(jnp.float32))
            .at[2, :A].set(bm.reshape(-1).astype(jnp.float32)))          # (3, LANES)

    kernel = functools.partial(_acnet_kernel, state_size=S, hidden_size=H)

    out = pl.pallas_call(
        kernel,
        out_shape=jax.ShapeDtypeStruct((2, B_pad, LANES), jnp.float32),
        grid=(B_pad // BM,),
        in_specs=[
            pl.BlockSpec((BM, S), lambda b: (b, 0)),        # x block (streams with grid)
            pl.BlockSpec((BM, LANES), lambda b: (b, 0)),    # eps block
            pl.BlockSpec((S + H, H), lambda b: (0, 0)),     # W1|W2 slab, VMEM-resident
            pl.BlockSpec((H, LANES), lambda b: (0, 0)),     # Wm (lane-padded), resident
            pl.BlockSpec((3, LANES), lambda b: (0, 0)),     # bias slab, resident
        ],
        out_specs=pl.BlockSpec((2, BM, LANES), lambda b: (0, b, 0)),
        compiler_params=pltpu.CompilerParams(
            dimension_semantics=("parallel",)),             # v7x: split batch across TCs
    )(x_pad, eps_pad, w12, wm_pad, bias)

    action = out[0, :B, :A]
    log_probs = out[1, :B, :A]
    return action, log_probs


def acnet_forward(x, params, eps):
    """Single-sample path matching ACNet.forward -> act: x flattened to (1, S).
    Returns (action, log_probs), each (1, A)."""
    return acnet_forward_batched(x.reshape(1, -1), params, eps.reshape(1, -1))


def acnet_reference(x, params, eps):
    """Pure-JAX reference (mirrors the torch module math, no constant folding)."""
    w1, b1, w2, b2, wm, bm = params
    h1 = jnp.maximum(x.astype(jnp.float32) @ w1 + b1, 0.0)
    h2 = jnp.maximum(h1 @ w2 + b2, 0.0)
    mu = jnp.tanh(h2 @ wm + bm)
    sigma = jnp.log1p(jnp.exp(jnp.float32(0.0))) + 1e-5     # softplus(0) + 1e-5
    action = mu + sigma * eps
    logp = (-((action - mu) ** 2) / (2.0 * sigma * sigma)
            - jnp.log(sigma) - 0.5 * jnp.log(2.0 * jnp.pi))
    return action, logp


def init_params(key, state_size, action_size, hidden_size=32):
    """Deterministic synthetic init mimicking nn.Linear defaults
    (uniform +/- 1/sqrt(fan_in)); mean_l weights scaled by 0.1 as in A2C_policy.
    Weights are stored (in_features, out_features) so the kernel computes x @ W."""
    ks = jax.random.split(key, 6)

    def uniform(k, shape, fan_in):
        bound = 1.0 / math.sqrt(fan_in)
        return jax.random.uniform(k, shape, jnp.float32, -bound, bound)

    w1 = uniform(ks[0], (state_size, hidden_size), state_size)
    b1 = uniform(ks[1], (hidden_size,), state_size)
    w2 = uniform(ks[2], (hidden_size, hidden_size), hidden_size)
    b2 = uniform(ks[3], (hidden_size,), hidden_size)
    wm = uniform(ks[4], (hidden_size, action_size), hidden_size) * 0.1
    bm = uniform(ks[5], (action_size,), hidden_size)
    return (w1, b1, w2, b2, wm, bm)


if __name__ == "__main__":
    STATE = 32      # state_size = (32,)
    ACTIONS = 8     # action_size = (8,)
    HIDDEN = 32
    BATCH = 256     # batched rollout states (128 rows per grid block)

    key = jax.random.PRNGKey(0)
    k_x, k_p, k_eps, k_x1, k_e1 = jax.random.split(key, 5)

    params = init_params(k_p, STATE, ACTIONS, HIDDEN)

    # ---- batched path (the fast path) ----
    xb = jax.random.normal(k_x, (BATCH, STATE), jnp.float32)
    # TODO(synk): torch's Normal.sample() RNG state has no TPU-kernel equivalent;
    # standard-normal eps is supplied externally as a deterministic stand-in.
    epsb = jax.random.normal(k_eps, (BATCH, ACTIONS), jnp.float32)

    action_b, logp_b = acnet_forward_batched(xb, params, epsb, block_rows=128)
    jax.block_until_ready((action_b, logp_b))

    ref_a, ref_l = acnet_reference(xb, params, epsb)
    assert action_b.shape == (BATCH, ACTIONS) and logp_b.shape == (BATCH, ACTIONS)
    assert bool(jnp.all(jnp.isfinite(action_b))) and bool(jnp.all(jnp.isfinite(logp_b)))
    assert bool(jnp.allclose(action_b, ref_a, rtol=1e-3, atol=1e-3))
    assert bool(jnp.allclose(logp_b, ref_l, rtol=1e-3, atol=1e-3))

    # ---- single-sample path (matches ACNet.forward -> act exactly) ----
    x1 = jax.random.normal(k_x1, (STATE,), jnp.float32)
    eps1 = jax.random.normal(k_e1, (1, ACTIONS), jnp.float32)
    action1, logp1 = acnet_forward(x1, params, eps1)
    jax.block_until_ready((action1, logp1))
    assert action1.shape == (1, ACTIONS) and logp1.shape == (1, ACTIONS)
    assert bool(jnp.all(jnp.isfinite(action1))) and bool(jnp.all(jnp.isfinite(logp1)))

    print("KERNEL_OK")
</pallas_src>

<mosaic_0001>
module attributes {stable_mosaic.version = 11 : i64} {
  func.func @_acnet_kernel(%arg0: i32, %arg1: memref<128x32xf32, #tpu.memory_space<vmem>>, %arg2: memref<128x128xf32, #tpu.memory_space<vmem>>, %arg3: memref<64x32xf32, #tpu.memory_space<vmem>>, %arg4: memref<32x128xf32, #tpu.memory_space<vmem>>, %arg5: memref<3x128xf32, #tpu.memory_space<vmem>>, %arg6: memref<2x128x128xf32, #tpu.memory_space<vmem>>) attributes {dimension_semantics = [#tpu.dimension_semantics<parallel>], iteration_bounds = array<i64: 2>, scalar_prefetch = 0 : i64, scratch_operands = 0 : i64, tpu.core_type = #tpu.core_type<tc>, window_params = [{transform_indices = @transform_0, window_bounds = array<i64: 128, 32>}, {transform_indices = @transform_1, window_bounds = array<i64: 128, 128>}, {pipeline_mode = #tpu.pipeline_mode<synchronous>, transform_indices = @transform_2, window_bounds = array<i64: 64, 32>}, {pipeline_mode = #tpu.pipeline_mode<synchronous>, transform_indices = @transform_3, window_bounds = array<i64: 32, 128>}, {pipeline_mode = #tpu.pipeline_mode<synchronous>, transform_indices = @transform_4, window_bounds = array<i64: 3, 128>}, {transform_indices = @transform_5, window_bounds = array<i64: 2, 128, 128>}]} {
    %c0 = arith.constant 0 : index
    %c0_0 = arith.constant 0 : index
    %0 = vector.load %arg1[%c0, %c0_0] : memref<128x32xf32, #tpu.memory_space<vmem>>, vector<128x32xf32>
    %c0_1 = arith.constant 0 : index
    %c0_2 = arith.constant 0 : index
    %1 = vector.load %arg3[%c0_1, %c0_2] : memref<64x32xf32, #tpu.memory_space<vmem>>, vector<32x32xf32>
    %c32 = arith.constant 32 : index
    %c0_3 = arith.constant 0 : index
    %2 = vector.load %arg3[%c32, %c0_3] : memref<64x32xf32, #tpu.memory_space<vmem>>, vector<32x32xf32>
    %c0_4 = arith.constant 0 : index
    %c0_5 = arith.constant 0 : index
    %3 = vector.load %arg5[%c0_4, %c0_5] : memref<3x128xf32, #tpu.memory_space<vmem>>, vector<1x32xf32>
    %c1 = arith.constant 1 : index
    %c0_6 = arith.constant 0 : index
    %4 = vector.load %arg5[%c1, %c0_6] : memref<3x128xf32, #tpu.memory_space<vmem>>, vector<1x32xf32>
    %c2 = arith.constant 2 : index
    %c0_7 = arith.constant 0 : index
    %5 = vector.load %arg5[%c2, %c0_7] : memref<3x128xf32, #tpu.memory_space<vmem>>, vector<1x128xf32>
    %cst = arith.constant dense<0.000000e+00> : vector<128x32xf32>
    %6 = tpu.matmul %0, %1, %cst {dimension_numbers = #tpu.dot_dimension_numbers<[1], [0], [0], [1], [0, 0, 1, 1], [], []>} : vector<128x32xf32>, vector<32x32xf32>, vector<128x32xf32> -> vector<128x32xf32>
    %7 = vector.broadcast %3 : vector<1x32xf32> to vector<128x32xf32>
    %8 = arith.addf %6, %7 : vector<128x32xf32>
    %cst_8 = arith.constant 0.000000e+00 : f32
    %9 = vector.broadcast %cst_8 : f32 to vector<128x32xf32>
    %10 = arith.maximumf %8, %9 : vector<128x32xf32>
    %cst_9 = arith.constant dense<0.000000e+00> : vector<128x32xf32>
    %11 = tpu.matmul %10, %2, %cst_9 {dimension_numbers = #tpu.dot_dimension_numbers<[1], [0], [0], [1], [0, 0, 1, 1], [], []>} : vector<128x32xf32>, vector<32x32xf32>, vector<128x32xf32> -> vector<128x32xf32>
    %12 = vector.broadcast %4 : vector<1x32xf32> to vector<128x32xf32>
    %13 = arith.addf %11, %12 : vector<128x32xf32>
    %cst_10 = arith.constant 0.000000e+00 : f32
    %14 = vector.broadcast %cst_10 : f32 to vector<128x32xf32>
    %15 = arith.maximumf %13, %14 : vector<128x32xf32>
    %c0_11 = arith.constant 0 : index
    %c0_12 = arith.constant 0 : index
    %16 = vector.load %arg4[%c0_11, %c0_12] : memref<32x128xf32, #tpu.memory_space<vmem>>, vector<32x128xf32>
    %cst_13 = arith.constant dense<0.000000e+00> : vector<128x128xf32>
    %17 = tpu.matmul %15, %16, %cst_13 {dimension_numbers = #tpu.dot_dimension_numbers<[1], [0], [0], [1], [0, 0, 1, 1], [], []>} : vector<128x32xf32>, vector<32x128xf32>, vector<128x128xf32> -> vector<128x128xf32>
    %18 = vector.broadcast %5 : vector<1x128xf32> to vector<128x128xf32>
    %19 = arith.addf %17, %18 : vector<128x128xf32>
    %20 = math.tanh %19 : vector<128x128xf32>
    %c0_14 = arith.constant 0 : index
    %c0_15 = arith.constant 0 : index
    %21 = vector.load %arg2[%c0_14, %c0_15] : memref<128x128xf32, #tpu.memory_space<vmem>>, vector<128x128xf32>
    %cst_16 = arith.constant 0.693157196 : f32
    %22 = vector.broadcast %cst_16 : f32 to vector<128x128xf32>
    %23 = arith.mulf %22, %21 : vector<128x128xf32>
    %24 = arith.addf %20, %23 : vector<128x128xf32>
    %25 = arith.mulf %21, %21 : vector<128x128xf32>
    %cst_17 = arith.constant -5.000000e-01 : f32
    %26 = vector.broadcast %cst_17 : f32 to vector<128x128xf32>
    %27 = arith.mulf %26, %25 : vector<128x128xf32>
    %cst_18 = arith.constant -0.552440047 : f32
    %28 = vector.broadcast %cst_18 : f32 to vector<128x128xf32>
    %29 = arith.addf %27, %28 : vector<128x128xf32>
    %c0_19 = arith.constant 0 : index
    %c0_20 = arith.constant 0 : index
    %c0_21 = arith.constant 0 : index
    %30 = vector.load %arg6[%c0_19, %c0_20, %c0_21] : memref<2x128x128xf32, #tpu.memory_space<vmem>>, vector<1x128x128xf32>
    %31 = vector.shape_cast %30 : vector<1x128x128xf32> to vector<128x128xf32>
    %32 = vector.shape_cast %24 : vector<128x128xf32> to vector<1x128x128xf32>
    tpu.vector_store %arg6[%c0_19, %c0_20, %c0_21], %32 {strides = array<i32>} : memref<2x128x128xf32, #tpu.memory_space<vmem>>, vector<1x128x128xf32>,
    %c1_22 = arith.constant 1 : index
    %c0_23 = arith.constant 0 : index
    %c0_24 = arith.constant 0 : index
    %33 = vector.load %arg6[%c1_22, %c0_23, %c0_24] : memref<2x128x128xf32, #tpu.memory_space<vmem>>, vector<1x128x128xf32>
    %34 = vector.shape_cast %33 : vector<1x128x128xf32> to vector<128x128xf32>
    %35 = vector.shape_cast %29 : vector<128x128xf32> to vector<1x128x128xf32>
    tpu.vector_store %arg6[%c1_22, %c0_23, %c0_24], %35 {strides = array<i32>} : memref<2x128x128xf32, #tpu.memory_space<vmem>>, vector<1x128x128xf32>,
    return
  }
  func.func @transform_0(%arg0: i32) -> (i32, i32) {
    %c0_i32 = arith.constant 0 : i32
    %c0_i32_0 = arith.constant 0 : i32
    return %arg0, %c0_i32 : i32, i32
  }
  func.func @transform_1(%arg0: i32) -> (i32, i32) {
    %c0_i32 = arith.constant 0 : i32
    %c0_i32_0 = arith.constant 0 : i32
    return %arg0, %c0_i32 : i32, i32
  }
  func.func @transform_2(%arg0: i32) -> (i32, i32) {
    %c0_i32 = arith.constant 0 : i32
    %c0_i32_0 = arith.constant 0 : i32
    %c0_i32_1 = arith.constant 0 : i32
    return %c0_i32, %c0_i32_0 : i32, i32
  }
  func.func @transform_3(%arg0: i32) -> (i32, i32) {
    %c0_i32 = arith.constant 0 : i32
    %c0_i32_0 = arith.constant 0 : i32
    %c0_i32_1 = arith.constant 0 : i32
    return %c0_i32, %c0_i32_0 : i32, i32
  }
  func.func @transform_4(%arg0: i32) -> (i32, i32) {
    %c0_i32 = arith.constant 0 : i32
    %c0_i32_0 = arith.constant 0 : i32
    %c0_i32_1 = arith.constant 0 : i32
    return %c0_i32, %c0_i32_0 : i32, i32
  }
  func.func @transform_5(%arg0: i32) -> (i32, i32, i32) {
    %c0_i32 = arith.constant 0 : i32
    %c0_i32_0 = arith.constant 0 : i32
    %c0_i32_1 = arith.constant 0 : i32
    return %c0_i32, %arg0, %c0_i32_0 : i32, i32, i32
  }
}

</mosaic_0001>

<bundles_post_ra>
// kernel: tpu_custom_call.1
= control target key start
LH: loop header
LB: loop body
LE: loop exit
PB: predicated region body
PF: predicated region fallthrough
CT: control target
= control target key end

     0   :  { %10 = vsyncpa [#allocation3], 0  ;;  %s1503_s0 = inlined_call_operand.vmem [shape: f32[256,32], index: 0, kind: input, shape index: {}]   ;;  %s1504_s1 = inlined_call_operand.vmem [shape: f32[256,128], index: 1, kind: input, shape index: {}]   ;;  %s1505_s2 = inlined_call_operand.vmem [shape: f32[64,32], index: 2, kind: input, shape index: {}]   ;;  %s1506_s3 = inlined_call_operand.vmem [shape: f32[32,128], index: 3, kind: input, shape index: {}]   ;;  %s1507_s4 = inlined_call_operand.vmem [shape: f32[3,128], index: 4, kind: input, shape index: {}]   ;;  %s1508_s5 = inlined_call_operand.hbm [shape: f32[2,256,128], index: 5, kind: output, shape index: {}]  }
   0x1   :  { %12 = vsyncpa [#allocation3 + $0x1], 0  ;;  %s1163_s18 = smov 0   ;;  %s1165_s19 = smov 0  }
   0x2   :  { %s1167_s20 = smov 0   ;;  %s1169_s21 = smov 0  }
   0x3 LB: > { %s1184_s22 = sadd.s32 4294967295, %s1124_s21   ;;  %s912_s23 = sadd.s32 4294967294, %s1124_s21   ;;  %s1124_s21 = sphi %s1169_s21, %s1514_s21   ;;  %s1120_s20 = sphi %s1167_s20, %s1513_s20   ;;  %s1116_s19 = sphi %s1165_s19, %s1512_s19   ;;  %s1112_s18 = sphi %s1163_s18, %s1511_s18  }
   0x4   : > { %s1188_s24 = sadd.s32 1, %s1124_s21   ;;  %s140_s25 = sadd.s32 1, %s1120_s20 }
   0x5   : > { %s137_s26 = ssub.s32 %s1124_s21, %s1188_s24  ;;  %p150_p0 = scmp.ne.s32.totalorder %s1120_s20, %s1116_s19 }
   0x6   : > { %p138_p1 = scmp.eq.s32.totalorder %s137_s26, 0  ;;  %p151_p2 = scmp.eq.s32.totalorder %s1184_s22, 1 }
   0x7   : > { %p156_p3 = scmp.ne.s32.totalorder %s1116_s19, %s1112_s18  ;;  %p157_p4 = scmp.eq.s32.totalorder %s912_s23, 1 }
   0x8   : > { %s1199_s27 = scalar_select %p138_p1, %s1120_s20, %s140_s25  }
   0x9   : > { %p1201_p5 = por %p151_p2, %p150_p0  ;;  %p1205_p6 = por %p157_p4, %p156_p3 }
   0xa   : > { %p915_p7 = scmp.ge.s32.totalorder %s1124_s21, 1  ;;  %p202_p8 = scmp.lt.s32.totalorder %s1124_s21, 3 }
   0xc   : > { %p203_p9 = pnand %p915_p7, %p202_p8 }
   0xd   : > { %s917_s9 = sshll.u32 (!%p203_p9), %s1184_s22, 4  ;;  %s232_s8 = sand.u32 (!%p203_p9), 1, %s1116_s19  }
   0xe   : > { %206 = sbr.rel (%p203_p9) target bundleno = 529 (0x211), region = 40  ;;  %p236_p10 = scmp.lt.s32.totalorder (!%p203_p9), %s917_s9, 31 }
   0xf   : > { %s916_s13 = sshll.u32 (!%p203_p9), %s232_s8, 8  ;;  %s800_s16 = scalar_lea.sflag (!%p203_p9), [#allocation3], %s232_s8 }
  0x10   : > { %s1375_s15 = scalar_lea.vmem (!%p203_p9), [#allocation2], %s916_s13 }
  0x13   : > { %v267_v0 = vld [vmem:[%s1505_s2 + $0x18] sm:$0xff]  ;;  %v266_v1 = vld [vmem:[%s1505_s2 + $0x10] sm:$0xff]  ;;  %v265_v2 = vld [vmem:[%s1505_s2 + $0x8] sm:$0xff]  ;;  %s1516_s9 = smov (!%p236_p10, %s917_s9), 31  ;;  %vm276_vm0 = vcmask 261120  }
  0x14   : > { %337 = vmatpush.msra.mxu0 %v267_v0  ;;  %991 = vmatpush.msra.mxu3 %v267_v0  ;;  %v264_v3 = vld [vmem:[%s1505_s2] sm:$0xff]  ;;  %s918_s14 = sshll.u32 %s1516_s9, 3  ;;  %v271_v16 = vld [vmem:[%s1505_s2 + $0x38] sm:$0xff]  ;;  %v270_v21 = vld [vmem:[%s1505_s2 + $0x30] sm:$0xff] }
  0x15   : > { %s1232_s17 = scalar_lea.vmem %s1503_s0, %s918_s14  ;;  %467 = vmatpush.msra.mxu1 %v271_v16  ;;  %v269_v22 = vld [vmem:[%s1505_s2 + $0x28] sm:$0xff]  ;;  %v268_v23 = vld [vmem:[%s1505_s2 + $0x20] sm:$0xff]  ;;  %v539_v61 = vld [vmem:[%s1506_s3 + $0x18] sm:$0xff]  ;;  %s1370_s12 = scalar_lea.vmem %s1504_s1, %s918_s14 }
  0x16   : > { %338 = vmatpush.msra.mxu0 %v266_v1  ;;  %992 = vmatpush.msra.mxu3 %v266_v1  ;;  %v248_v4 = vld [vmem:[%s1232_s17] sm:$0xff]  ;;  %v249_v5 = vld [vmem:[%s1232_s17 + $0x8] sm:$0xff]  ;;  %v250_v6 = vld [vmem:[%s1232_s17 + $0x10] sm:$0xff] }
  0x17   : > { %v260_v7 = vld [vmem:[%s1232_s17 + $0x60] sm:$0xff]  ;;  %v251_v8 = vld [vmem:[%s1232_s17 + $0x18] sm:$0xff]  ;;  %v261_v9 = vld [vmem:[%s1232_s17 + $0x68] sm:$0xff]  ;;  %468 = vmatpush.msra.mxu1 %v270_v21  ;;  %601 = vmatpush.msra.mxu2 %v539_v61 }
  0x18   : > { %339 = vmatpush.msra.mxu0 %v265_v2  ;;  %993 = vmatpush.msra.mxu3 %v265_v2  ;;  %v252_v10 = vld [vmem:[%s1232_s17 + $0x20] sm:$0xff]  ;;  %v262_v11 = vld [vmem:[%s1232_s17 + $0x70] sm:$0xff]  ;;  %v253_v12 = vld [vmem:[%s1232_s17 + $0x28] sm:$0xff] }
  0x19   : > { %v263_v13 = vld [vmem:[%s1232_s17 + $0x78] sm:$0xff]  ;;  %v254_v14 = vld [vmem:[%s1232_s17 + $0x30] sm:$0xff]  ;;  %v256_v17 = vld [vmem:[%s1232_s17 + $0x40] sm:$0xff]  ;;  %469 = vmatpush.msra.mxu1 %v269_v22 }
  0x1a   : > { %340 = vmatpush.msra.mxu0 %v264_v3  ;;  %994 = vmatpush.msra.mxu3 %v264_v3  ;;  %v255_v15 = vld [vmem:[%s1232_s17 + $0x38] sm:$0xff]  ;;  %v257_v18 = vld [vmem:[%s1232_s17 + $0x48] sm:$0xff]  ;;  %v258_v19 = vld [vmem:[%s1232_s17 + $0x50] sm:$0xff] }
  0x1b   : > { %921 = vmatmul.msk.f32.vlgmr.msra.gmra.mxu0 %vm276_vm0, %v248_v4  ;;  %933 = vmatmul.msk.f32.vlgmr.msra.gmra.mxu3 %vm276_vm0, %v260_v7  ;;  %v259_v20 = vld [vmem:[%s1232_s17 + $0x58] sm:$0xff]  ;;  %v1281_v24 = vld [vmem:[%s1507_s4] ss:$0 sm:$0xff] }
  0x1c   : > { %995 = vmatpush.msrb.mxu3 %v271_v16  ;;  %470 = vmatpush.msra.mxu1 %v268_v23 }
  0x1e   : > { %996 = vmatpush.msrb.mxu3 %v270_v21 }
  0x20   : > { %997 = vmatpush.msrb.mxu3 %v269_v22 }
  0x22   : > { %998 = vmatpush.msrb.mxu3 %v268_v23 }
  0x23   : > { %922 = vmatmul.msk.f32.gmra.mxu0 %vm276_vm0, %v249_v5  ;;  %934 = vmatmul.msk.f32.gmra.mxu3 %vm276_vm0, %v261_v9 }
  0x24   : > { %999 = vmatpush.msra.mxu3 %v539_v61 }
  0x2b   : > { %923 = vmatmul.msk.f32.gmra.mxu0 %vm276_vm0, %v250_v6  ;;  %935 = vmatmul.msk.f32.gmra.mxu3 %vm276_vm0, %v262_v11  ;;  %v537_v11 = vld [vmem:[%s1506_s3 + $0x8] sm:$0xff] }
  0x33   : > { %924 = vmatmul.msk.f32.gmra.mxu0 %vm276_vm0, %v251_v8  ;;  %936 = vmatmul.msk.f32.gmra.mxu3 %vm276_vm0, %v263_v13  ;;  %v1330_v13 = vld [vmem:[%s1507_s4 + $0x1] ss:$0 sm:$0xff] }
  0x3b   : > { %925 = vmatmul.msk.f32.gmra.mxu0 %vm276_vm0, %v252_v10  ;;  %v538_v10 = vld [vmem:[%s1506_s3 + $0x10] sm:$0xff] }
  0x3c   : > { %602 = vmatpush.msra.mxu2 %v538_v10  ;;  %1000 = vmatpush.msra.mxu3 %v538_v10 }
  0x3e   : > { %603 = vmatpush.msra.mxu2 %v537_v11  ;;  %1001 = vmatpush.msra.mxu3 %v537_v11 }
  0x43   : > { %926 = vmatmul.msk.f32.gmra.mxu0 %vm276_vm0, %v253_v12  ;;  %v536_v12 = vld [vmem:[%s1506_s3] sm:$0xff] }
  0x44   : > { %604 = vmatpush.msra.mxu2 %v536_v12  ;;  %1002 = vmatpush.msra.mxu3 %v536_v12 }
  0x4b   : > { %927 = vmatmul.msk.f32.gmra.mxu0 %vm276_vm0, %v254_v14 }
  0x53   : > { %928 = vmatmul.msk.f32.gmra.mxu0 %vm276_vm0, %v255_v15 }
  0x5b   : > { %929 = vmatmul.msk.f32.gmra.mxu0 %vm276_vm0, %v256_v17 }
  0x63   : > { %930 = vmatmul.msk.f32.gmra.mxu0 %vm276_vm0, %v257_v18 }
  0x6b   : > { %931 = vmatmul.msk.f32.gmra.mxu0 %vm276_vm0, %v258_v19 }
  0x73   : > { %932 = vmatmul.msk.f32.gmra.mxu0 %vm276_vm0, %v259_v20 }
  0x98   : > { %v342_v25 = vpop.f32.mrf.mxu0 }
  0x99   : > { %v343_v26 = vadd.f32 %v1281_v24, %v342_v25 }
  0x9b   : > { %v390_v27 = vmax.f32 %v343_v26, 0.0 }
  0x9d   : > { %937 = vmatmul.msk.f32.vlgmr.msra.gmra.mxu1 %vm276_vm0, %v390_v27 }
  0x9e   : > { %v378_v36 = vpop.f32.mrf.mxu3 }
  0x9f   : > { %v379_v38 = vadd.f32 %v1281_v24, %v378_v36 }
  0xa0   : > { %v345_v28 = vpop.f32.mrf.mxu0 }
  0xa1   : > { %v346_v29 = vadd.f32 %v1281_v24, %v345_v28  ;;  %v402_v39 = vmax.f32 %v379_v38, 0.0 }
  0xa3   : > { %v391_v30 = vmax.f32 %v346_v29, 0.0  ;;  %949 = vmatmul.msk.f32.vlgmr.msrb.gmra.mxu3 %vm276_vm0, %v402_v39 }
  0xa5   : > { %938 = vmatmul.msk.f32.gmra.mxu1 %vm276_vm0, %v391_v30 }
  0xa6   : > { %v381_v42 = vpop.f32.mrf.mxu3 }
  0xa7   : > { %v382_v44 = vadd.f32 %v1281_v24, %v381_v42 }
  0xa8   : > { %v348_v31 = vpop.f32.mrf.mxu0 }
  0xa9   : > { %v349_v32 = vadd.f32 %v1281_v24, %v348_v31  ;;  %v403_v45 = vmax.f32 %v382_v44, 0.0 }
  0xab   : > { %v392_v33 = vmax.f32 %v349_v32, 0.0  ;;  %950 = vmatmul.msk.f32.gmra.mxu3 %vm276_vm0, %v403_v45 }
  0xad   : > { %939 = vmatmul.msk.f32.gmra.mxu1 %vm276_vm0, %v392_v33 }
  0xae   : > { %v384_v48 = vpop.f32.mrf.mxu3 }
  0xaf   : > { %v385_v50 = vadd.f32 %v1281_v24, %v384_v48 }
  0xb0   : > { %v351_v34 = vpop.f32.mrf.mxu0 }
  0xb1   : > { %v352_v35 = vadd.f32 %v1281_v24, %v351_v34  ;;  %v404_v51 = vmax.f32 %v385_v50, 0.0 }
  0xb3   : > { %v393_v37 = vmax.f32 %v352_v35, 0.0  ;;  %951 = vmatmul.msk.f32.gmra.mxu3 %vm276_vm0, %v404_v51 }
  0xb5   : > { %940 = vmatmul.msk.f32.gmra.mxu1 %vm276_vm0, %v393_v37 }
  0xb6   : > { %v387_v54 = vpop.f32.mrf.mxu3 }
  0xb7   : > { %v388_v56 = vadd.f32 %v1281_v24, %v387_v54 }
  0xb8   : > { %v354_v40 = vpop.f32.mrf.mxu0 }
  0xb9   : > { %v355_v41 = vadd.f32 %v1281_v24, %v354_v40  ;;  %v405_v57 = vmax.f32 %v388_v56, 0.0 }
  0xbb   : > { %v394_v43 = vmax.f32 %v355_v41, 0.0  ;;  %952 = vmatmul.msk.f32.gmra.mxu3 %vm276_vm0, %v405_v57 }
  0xbd   : > { %941 = vmatmul.msk.f32.gmra.mxu1 %vm276_vm0, %v394_v43 }
  0xc0   : > { %v357_v46 = vpop.f32.mrf.mxu0 }
  0xc1   : > { %v358_v47 = vadd.f32 %v1281_v24, %v357_v46 }
  0xc3   : > { %v395_v49 = vmax.f32 %v358_v47, 0.0 }
  0xc5   : > { %942 = vmatmul.msk.f32.gmra.mxu1 %vm276_vm0, %v395_v49 }
  0xc8   : > { %v360_v52 = vpop.f32.mrf.mxu0 }
  0xc9   : > { %v361_v53 = vadd.f32 %v1281_v24, %v360_v52 }
  0xcb   : > { %v396_v55 = vmax.f32 %v361_v53, 0.0 }
  0xcd   : > { %943 = vmatmul.msk.f32.gmra.mxu1 %vm276_vm0, %v396_v55 }
  0xd0   : > { %v363_v58 = vpop.f32.mrf.mxu0 }
  0xd1   : > { %v364_v59 = vadd.f32 %v1281_v24, %v363_v58 }
  0xd3   : > { %v397_v60 = vmax.f32 %v364_v59, 0.0 }
  0xd5   : > { %944 = vmatmul.msk.f32.gmra.mxu1 %vm276_vm0, %v397_v60 }
  0xd8   : > { %v366_v62 = vpop.f32.mrf.mxu0 }
  0xd9   : > { %v367_v63 = vadd.f32 %v1281_v24, %v366_v62  ;;  %v670_v62 = vld [vmem:[%s1370_s12] sm:$0xff] }
  0xdb   : > { %v398_v0 = vmax.f32 %v367_v63, 0.0  ;;  %v718_v63 = vmul.f32 %v670_v62, %v670_v62 }
  0xdd   : > { %945 = vmatmul.msk.f32.gmra.mxu1 %vm276_vm0, %v398_v0  ;;  %v734_v0 = vmul.f32 -0.5, %v718_v63 }
  0xe0   : > { %v369_v1 = vpop.f32.mrf.mxu0 }
  0xe1   : > { %v370_v2 = vadd.f32 %v1281_v24, %v369_v1  ;;  %v750_v1 = vadd.f32 -0.55244005, %v734_v0 }
  0xe3   : > { %v399_v3 = vmax.f32 %v370_v2, 0.0  ;;  %969 = vst [vmem:[%s1375_s15 + $0x80] sm:$0xff] %v750_v1  ;;  %v671_v2 = vld [vmem:[%s1370_s12 + $0x8] sm:$0xff] }
  0xe5   : > { %946 = vmatmul.msk.f32.gmra.mxu1 %vm276_vm0, %v399_v3  ;;  %v719_v3 = vmul.f32 %v671_v2, %v671_v2 }
  0xe8   : > { %v372_v4 = vpop.f32.mrf.mxu0 }
  0xe9   : > { %v373_v5 = vadd.f32 %v1281_v24, %v372_v4  ;;  %v735_v4 = vmul.f32 -0.5, %v719_v3 }
  0xeb   : > { %v400_v6 = vmax.f32 %v373_v5, 0.0  ;;  %v751_v5 = vadd.f32 -0.55244005, %v735_v4 }
  0xed   : > { %947 = vmatmul.msk.f32.gmra.mxu1 %vm276_vm0, %v400_v6  ;;  %970 = vst [vmem:[%s1375_s15 + $0x88] sm:$0xff] %v751_v5  ;;  %v672_v6 = vld [vmem:[%s1370_s12 + $0x10] sm:$0xff] }
  0xf0   : > { %v375_v7 = vpop.f32.mrf.mxu0 }
  0xf1   : > { %v376_v8 = vadd.f32 %v1281_v24, %v375_v7  ;;  %v720_v7 = vmul.f32 %v672_v6, %v672_v6 }
  0xf3   : > { %v401_v9 = vmax.f32 %v376_v8, 0.0  ;;  %v736_v8 = vmul.f32 -0.5, %v720_v7 }
  0xf5   : > { %948 = vmatmul.msk.f32.gmra.mxu1 %vm276_vm0, %v401_v9  ;;  %v1384_v9 = vld [vmem:[%s1507_s4 + $0x2] ss:$0 sm:$0xff]  ;;  %v752_v10 = vadd.f32 -0.55244005, %v736_v8 }
  0xf7   : > { %971 = vst [vmem:[%s1375_s15 + $0x90] sm:$0xff] %v752_v10  ;;  %v683_v10 = vld [vmem:[%s1370_s12 + $0x68] sm:$0xff] }
 0x11a   : > { %v472_v14 = vpop.f32.mrf.mxu1 }
 0x11b   : > { %v473_v15 = vadd.f32 %v1330_v13, %v472_v14 }
 0x11d   : > { %v520_v16 = vmax.f32 %v473_v15, 0.0 }
 0x11f   : > { %953 = vmatmul.msk.f32.vlgmr.msra.gmra.mxu2 %vm276_vm0, %v520_v16  ;;  %v686_v16 = vmul.f32 0.6931572, %v670_v62  ;;  %v1418_v62 = vld [vmem:[%s1370_s12 + $0x40] sm:$0xff] }
 0x122   : > { %v475_v17 = vpop.f32.mrf.mxu1 }
 0x123   : > { %v476_v18 = vadd.f32 %v1330_v13, %v475_v17 }
 0x125   : > { %v521_v19 = vmax.f32 %v476_v18, 0.0 }
 0x126   : > { %v508_v27 = vpop.f32.mrf.mxu3 }
 0x127   : > { %954 = vmatmul.msk.f32.gmra.mxu2 %vm276_vm0, %v521_v19  ;;  %v509_v29 = vadd.f32 %v1330_v13, %v508_v27 }
 0x129   : > { %v532_v31 = vmax.f32 %v509_v29, 0.0 }
 0x12a   : > { %v478_v20 = vpop.f32.mrf.mxu1 }
 0x12b   : > { %v479_v21 = vadd.f32 %v1330_v13, %v478_v20  ;;  %965 = vmatmul.msk.f32.vlgmr.msra.gmra.mxu3 %vm276_vm0, %v532_v31 }
 0x12d   : > { %v522_v22 = vmax.f32 %v479_v21, 0.0  ;;  %v674_v21 = vld [vmem:[%s1370_s12 + $0x20] sm:$0xff] }
 0x12e   : > { %v511_v33 = vpop.f32.mrf.mxu3 }
 0x12f   : > { %955 = vmatmul.msk.f32.gmra.mxu2 %vm276_vm0, %v522_v22  ;;  %v512_v35 = vadd.f32 %v1330_v13, %v511_v33 }
 0x131   : > { %v533_v37 = vmax.f32 %v512_v35, 0.0 }
 0x132   : > { %v481_v23 = vpop.f32.mrf.mxu1 }
 0x133   : > { %v482_v24 = vadd.f32 %v1330_v13, %v481_v23  ;;  %966 = vmatmul.msk.f32.gmra.mxu3 %vm276_vm0, %v533_v37  ;;  %v722_v23 = vmul.f32 %v674_v21, %v674_v21 }
 0x135   : > { %v523_v25 = vmax.f32 %v482_v24, 0.0  ;;  %v738_v24 = vmul.f32 -0.5, %v722_v23 }
 0x136   : > { %v514_v39 = vpop.f32.mrf.mxu3 }
 0x137   : > { %956 = vmatmul.msk.f32.gmra.mxu2 %vm276_vm0, %v523_v25  ;;  %v515_v41 = vadd.f32 %v1330_v13, %v514_v39  ;;  %v687_v25 = vmul.f32 0.6931572, %v671_v2  ;;  %v1400_v39 = vld [vmem:[%s1370_s12 + $0x30] sm:$0xff]  ;;  %v726_v2 = vmul.f32 %v1418_v62, %v1418_v62 }
 0x139   : > { %v534_v43 = vmax.f32 %v515_v41, 0.0  ;;  %v724_v41 = vmul.f32 %v1400_v39, %v1400_v39  ;;  %v742_v4 = vmul.f32 -0.5, %v726_v2 }
 0x13a   : > { %v484_v26 = vpop.f32.mrf.mxu1 }
 0x13b   : > { %v485_v28 = vadd.f32 %v1330_v13, %v484_v26  ;;  %967 = vmatmul.msk.f32.gmra.mxu3 %vm276_vm0, %v534_v43  ;;  %v754_v26 = vadd.f32 -0.55244005, %v738_v24  ;;  %v758_v7 = vadd.f32 -0.55244005, %v742_v4  ;;  %v731_v24 = vmul.f32 %v683_v10, %v683_v10 }
 0x13d   : > { %v524_v30 = vmax.f32 %v485_v28, 0.0  ;;  %973 = vst [vmem:[%s1375_s15 + $0xa0] sm:$0xff] %v754_v26 }
 0x13e   : > { %v517_v45 = vpop.f32.mrf.mxu3  ;;  %977 = vst [vmem:[%s1375_s15 + $0xc0] sm:$0xff] %v758_v7 }
 0x13f   : > { %957 = vmatmul.msk.f32.gmra.mxu2 %vm276_vm0, %v524_v30  ;;  %v518_v47 = vadd.f32 %v1330_v13, %v517_v45  ;;  %v675_v30 = vld [vmem:[%s1370_s12 + $0x28] sm:$0xff] }
 0x141   : > { %v535_v49 = vmax.f32 %v518_v47, 0.0 }
 0x142   : > { %v487_v32 = vpop.f32.mrf.mxu1 }
 0x143   : > { %v488_v34 = vadd.f32 %v1330_v13, %v487_v32  ;;  %968 = vmatmul.msk.f32.gmra.mxu3 %vm276_vm0, %v535_v49  ;;  %v723_v32 = vmul.f32 %v675_v30, %v675_v30  ;;  %v1408_v49 = vld [vmem:[%s1370_s12 + $0x38] sm:$0xff] }
 0x145   : > { %v525_v36 = vmax.f32 %v488_v34, 0.0  ;;  %v739_v33 = vmul.f32 -0.5, %v723_v32  ;;  %v688_v34 = vmul.f32 0.6931572, %v672_v6  ;;  %v691_v6 = vmul.f32 0.6931572, %v675_v30 }
 0x147   : > { %958 = vmatmul.msk.f32.gmra.mxu2 %vm276_vm0, %v525_v36  ;;  %v755_v35 = vadd.f32 -0.55244005, %v739_v33 }
 0x149   : > { %974 = vst [vmem:[%s1375_s15 + $0xa8] sm:$0xff] %v755_v35  ;;  %v680_v35 = vld [vmem:[%s1370_s12 + $0x50] sm:$0xff] }
 0x14a   : > { %v490_v38 = vpop.f32.mrf.mxu1 }
 0x14b   : > { %v491_v40 = vadd.f32 %v1330_v13, %v490_v38 }
 0x14d   : > { %v526_v42 = vmax.f32 %v491_v40, 0.0 }
 0x14f   : > { %959 = vmatmul.msk.f32.gmra.mxu2 %vm276_vm0, %v526_v42  ;;  %v740_v42 = vmul.f32 -0.5, %v724_v41 }
 0x152   : > { %v493_v44 = vpop.f32.mrf.mxu1 }
 0x153   : > { %v494_v46 = vadd.f32 %v1330_v13, %v493_v44  ;;  %v756_v44 = vadd.f32 -0.55244005, %v740_v42 }
 0x155   : > { %v527_v48 = vmax.f32 %v494_v46, 0.0  ;;  %975 = vst [vmem:[%s1375_s15 + $0xb0] sm:$0xff] %v756_v44  ;;  %v693_v44 = vmul.f32 0.6931572, %v1408_v49 }
 0x157   : > { %960 = vmatmul.msk.f32.gmra.mxu2 %vm276_vm0, %v527_v48 }
 0x15a   : > { %v496_v50 = vpop.f32.mrf.mxu1 }
 0x15b   : > { %v497_v51 = vadd.f32 %v1330_v13, %v496_v50 }
 0x15d   : > { %v528_v52 = vmax.f32 %v497_v51, 0.0 }
 0x15f   : > { %961 = vmatmul.msk.f32.gmra.mxu2 %vm276_vm0, %v528_v52  ;;  %v725_v52 = vmul.f32 %v1408_v49, %v1408_v49 }
 0x162   : > { %v499_v53 = vpop.f32.mrf.mxu1 }
 0x163   : > { %v500_v54 = vadd.f32 %v1330_v13, %v499_v53  ;;  %v741_v53 = vmul.f32 -0.5, %v725_v52 }
 0x165   : > { %v529_v55 = vmax.f32 %v500_v54, 0.0  ;;  %v690_v54 = vmul.f32 0.6931572, %v674_v21 }
 0x167   : > { %962 = vmatmul.msk.f32.gmra.mxu2 %vm276_vm0, %v529_v55  ;;  %v757_v55 = vadd.f32 -0.55244005, %v741_v53 }
 0x169   : > { %976 = vst [vmem:[%s1375_s15 + $0xb8] sm:$0xff] %v757_v55 }
 0x16a   : > { %v502_v56 = vpop.f32.mrf.mxu1 }
 0x16b   : > { %v503_v57 = vadd.f32 %v1330_v13, %v502_v56  ;;  %v682_v56 = vld [vmem:[%s1370_s12 + $0x60] sm:$0xff] }
 0x16c   : > { %v730_v5 = vmul.f32 %v682_v56, %v682_v56 }
 0x16d   : > { %v530_v58 = vmax.f32 %v503_v57, 0.0 }
 0x16e   : > { %v746_v8 = vmul.f32 -0.5, %v730_v5 }
 0x16f   : > { %963 = vmatmul.msk.f32.gmra.mxu2 %vm276_vm0, %v530_v58  ;;  %v698_v58 = vmul.f32 0.6931572, %v682_v56 }
 0x172   : > { %v505_v59 = vpop.f32.mrf.mxu1 }
 0x173   : > { %v506_v60 = vadd.f32 %v1330_v13, %v505_v59  ;;  %v673_v13 = vld [vmem:[%s1370_s12 + $0x18] sm:$0xff] }
 0x174   : > { %v721_v14 = vmul.f32 %v673_v13, %v673_v13  ;;  %v689_v43 = vmul.f32 0.6931572, %v673_v13  ;;  %v699_v13 = vmul.f32 0.6931572, %v683_v10 }
 0x175   : > { %v531_v61 = vmax.f32 %v506_v60, 0.0 }
 0x176   : > { %v737_v15 = vmul.f32 -0.5, %v721_v14 }
 0x177   : > { %964 = vmatmul.msk.f32.gmra.mxu2 %vm276_vm0, %v531_v61 }
 0x178   : > { %v753_v17 = vadd.f32 -0.55244005, %v737_v15 }
 0x17a   : > { %972 = vst [vmem:[%s1375_s15 + $0x98] sm:$0xff] %v753_v17  ;;  %v1429_v17 = vld [vmem:[%s1370_s12 + $0x48] sm:$0xff] }
 0x17b   : > { %v727_v21 = vmul.f32 %v1429_v17, %v1429_v17  ;;  %v695_v4 = vmul.f32 0.6931572, %v1429_v17 }
 0x17d   : > { %v743_v23 = vmul.f32 -0.5, %v727_v21 }
 0x17f   : > { %v759_v26 = vadd.f32 -0.55244005, %v743_v23 }
 0x181   : > { %978 = vst [vmem:[%s1375_s15 + $0xc8] sm:$0xff] %v759_v26 }
 0x1a2   : > { %v606_v11 = vpop.f32.mrf.mxu2 }
 0x1a3   : > { %v607_v12 = vadd.f32 %v1384_v9, %v606_v11 }
 0x1a5   : > { %1058 = vtanh.f32 %v607_v12  ;;  %v762_v12 = vadd.f32 -0.55244005, %v746_v8 }
 0x1a7   : > { %981 = vst [vmem:[%s1375_s15 + $0xe0] sm:$0xff] %v762_v12 }
 0x1aa   : > { %v609_v18 = vpop.f32.mrf.mxu2 }
 0x1ab   : > { %v1059_v19 = vpop.eup %1058  ;;  %v610_v20 = vadd.f32 %v1384_v9, %v609_v18 }
 0x1ac   : > { %v702_v22 = vadd.f32 %v1059_v19, %v686_v16 }
 0x1ad   : > { %1060 = vtanh.f32 %v610_v20 }
 0x1ae   : > { %766 = vst [vmem:[%s1375_s15] sm:$0xff] %v702_v22  ;;  %v642_v46 = vpop.f32.mrf.mxu3 }
 0x1af   : > { %v643_v50 = vadd.f32 %v1384_v9, %v642_v46 }
 0x1b2   : > { %v612_v27 = vpop.f32.mrf.mxu2 }
 0x1b3   : > { %v1061_v28 = vpop.eup %1060  ;;  %v613_v29 = vadd.f32 %v1384_v9, %v612_v27  ;;  %v747_v27 = vmul.f32 -0.5, %v731_v24 }
 0x1b4   : > { %v703_v31 = vadd.f32 %v1061_v28, %v687_v25  ;;  %v692_v25 = vmul.f32 0.6931572, %v1400_v39  ;;  %v684_v28 = vld [vmem:[%s1370_s12 + $0x70] sm:$0xff]  ;;  %v728_v39 = vmul.f32 %v680_v35, %v680_v35 }
 0x1b5   : > { %1062 = vtanh.f32 %v613_v29  ;;  %v763_v30 = vadd.f32 -0.55244005, %v747_v27  ;;  %v732_v42 = vmul.f32 %v684_v28, %v684_v28 }
 0x1b6   : > { %767 = vst [vmem:[%s1375_s15 + $0x8] sm:$0xff] %v703_v31  ;;  %v645_v59 = vpop.f32.mrf.mxu3  ;;  %v700_v31 = vmul.f32 0.6931572, %v684_v28  ;;  %v744_v41 = vmul.f32 -0.5, %v728_v39 }
 0x1b7   : > { %v646_v63 = vadd.f32 %v1384_v9, %v645_v59  ;;  %982 = vst [vmem:[%s1375_s15 + $0xe8] sm:$0xff] %v763_v30 }
 0x1b8   : > { %v760_v46 = vadd.f32 -0.55244005, %v744_v41 }
 0x1ba   : > { %v615_v36 = vpop.f32.mrf.mxu2  ;;  %979 = vst [vmem:[%s1375_s15 + $0xd0] sm:$0xff] %v760_v46 }
 0x1bb   : > { %v1063_v37 = vpop.eup %1062  ;;  %v616_v38 = vadd.f32 %v1384_v9, %v615_v36 }
 0x1bc   : > { %v704_v40 = vadd.f32 %v1063_v37, %v688_v34 }
 0x1bd   : > { %1064 = vtanh.f32 %v616_v38 }
 0x1be   : > { %768 = vst [vmem:[%s1375_s15 + $0x10] sm:$0xff] %v704_v40  ;;  %v648_v14 = vpop.f32.mrf.mxu3 }
 0x1bf   : > { %v649_v18 = vadd.f32 %v1384_v9, %v648_v14 }
 0x1c2   : > { %v618_v45 = vpop.f32.mrf.mxu2 }
 0x1c3   : > { %v1065_v47 = vpop.eup %1064  ;;  %v619_v48 = vadd.f32 %v1384_v9, %v618_v45  ;;  %v685_v45 = vld [vmem:[%s1370_s12 + $0x78] sm:$0xff] }
 0x1c4   : > { %v705_v51 = vadd.f32 %v1065_v47, %v689_v43  ;;  %v681_v43 = vld [vmem:[%s1370_s12 + $0x58] sm:$0xff]  ;;  %v748_v47 = vmul.f32 -0.5, %v732_v42 }
 0x1c5   : > { %1066 = vtanh.f32 %v619_v48  ;;  %v729_v48 = vmul.f32 %v681_v43, %v681_v43  ;;  %v697_v14 = vmul.f32 0.6931572, %v681_v43 }
 0x1c6   : > { %769 = vst [vmem:[%s1375_s15 + $0x18] sm:$0xff] %v705_v51  ;;  %1068 = vtanh.f32 %v643_v50  ;;  %v651_v32 = vpop.f32.mrf.mxu3  ;;  %v733_v50 = vmul.f32 %v685_v45, %v685_v45  ;;  %v764_v52 = vadd.f32 -0.55244005, %v748_v47 }
 0x1c7   : > { %v652_v36 = vadd.f32 %v1384_v9, %v651_v32  ;;  %v745_v53 = vmul.f32 -0.5, %v729_v48 }
 0x1c8   : > { %v749_v49 = vmul.f32 -0.5, %v733_v50  ;;  %983 = vst [vmem:[%s1375_s15 + $0xf0] sm:$0xff] %v764_v52 }
 0x1c9   : > { %v761_v59 = vadd.f32 -0.55244005, %v745_v53 }
 0x1ca   : > { %v621_v57 = vpop.f32.mrf.mxu2 }
 0x1cb   : > { %v1067_v60 = vpop.eup %1066  ;;  %v622_v61 = vadd.f32 %v1384_v9, %v621_v57  ;;  %980 = vst [vmem:[%s1375_s15 + $0xd8] sm:$0xff] %v761_v59 }
 0x1cc   : > { %v1069_v0 = vpop.eup %1068  ;;  %v706_v1 = vadd.f32 %v1067_v60, %v690_v54  ;;  %v701_v54 = vmul.f32 0.6931572, %v685_v45 }
 0x1cd   : > { %1070 = vtanh.f32 %v622_v61  ;;  %v714_v3 = vadd.f32 %v1069_v0, %v698_v58  ;;  %v765_v61 = vadd.f32 -0.55244005, %v749_v49 }
 0x1ce   : > { %770 = vst [vmem:[%s1375_s15 + $0x20] sm:$0xff] %v706_v1  ;;  %1072 = vtanh.f32 %v646_v63  ;;  %v694_v63 = vmul.f32 0.6931572, %v1418_v62  ;;  %v696_v62 = vmul.f32 0.6931572, %v680_v35 }
 0x1cf   : > { %778 = vst [vmem:[%s1375_s15 + $0x60] sm:$0xff] %v714_v3 }
 0x1d0   : > { %984 = vst [vmem:[%s1375_s15 + $0xf8] sm:$0xff] %v765_v61 }
 0x1d2   : > { %v624_v11 = vpop.f32.mrf.mxu2 }
 0x1d3   : > { %v1071_v15 = vpop.eup %1070  ;;  %v625_v16 = vadd.f32 %v1384_v9, %v624_v11 }
 0x1d4   : > { %v1073_v19 = vpop.eup %1072  ;;  %v707_v20 = vadd.f32 %v1071_v15, %v691_v6 }
 0x1d5   : > { %1074 = vtanh.f32 %v625_v16  ;;  %v715_v22 = vadd.f32 %v1073_v19, %v699_v13 }
 0x1d6   : > { %771 = vst [vmem:[%s1375_s15 + $0x28] sm:$0xff] %v707_v20  ;;  %1076 = vtanh.f32 %v649_v18 }
 0x1d7   : > { %779 = vst [vmem:[%s1375_s15 + $0x68] sm:$0xff] %v715_v22 }
 0x1da   : > { %v627_v29 = vpop.f32.mrf.mxu2 }
 0x1db   : > { %v1075_v33 = vpop.eup %1074  ;;  %v628_v34 = vadd.f32 %v1384_v9, %v627_v29 }
 0x1dc   : > { %v1077_v37 = vpop.eup %1076  ;;  %v708_v38 = vadd.f32 %v1075_v33, %v692_v25 }
 0x1dd   : > { %1078 = vtanh.f32 %v628_v34  ;;  %v716_v40 = vadd.f32 %v1077_v37, %v700_v31 }
 0x1de   : > { %772 = vst [vmem:[%s1375_s15 + $0x30] sm:$0xff] %v708_v38  ;;  %1080 = vtanh.f32 %v652_v36 }
 0x1df   : > { %780 = vst [vmem:[%s1375_s15 + $0x70] sm:$0xff] %v716_v40 }
 0x1e2   : > { %v630_v51 = vpop.f32.mrf.mxu2 }
 0x1e3   : > { %v1079_v55 = vpop.eup %1078  ;;  %v631_v56 = vadd.f32 %v1384_v9, %v630_v51 }
 0x1e4   : > { %v1081_v57 = vpop.eup %1080  ;;  %v709_v58 = vadd.f32 %v1079_v55, %v693_v44 }
 0x1e5   : > { %1082 = vtanh.f32 %v631_v56  ;;  %v717_v60 = vadd.f32 %v1081_v57, %v701_v54 }
 0x1e6   : > { %773 = vst [vmem:[%s1375_s15 + $0x38] sm:$0xff] %v709_v58 }
 0x1e7   : > { %781 = vst [vmem:[%s1375_s15 + $0x78] sm:$0xff] %v717_v60 }
 0x1ea   : > { %v633_v0 = vpop.f32.mrf.mxu2 }
 0x1eb   : > { %v1083_v1 = vpop.eup %1082  ;;  %v634_v2 = vadd.f32 %v1384_v9, %v633_v0 }
 0x1ec   : > { %v710_v3 = vadd.f32 %v1083_v1, %v694_v63 }
 0x1ed   : > { %1084 = vtanh.f32 %v634_v2 }
 0x1ee   : > { %774 = vst [vmem:[%s1375_s15 + $0x40] sm:$0xff] %v710_v3 }
 0x1f2   : > { %v636_v5 = vpop.f32.mrf.mxu2 }
 0x1f3   : > { %v1085_v6 = vpop.eup %1084  ;;  %v637_v7 = vadd.f32 %v1384_v9, %v636_v5 }
 0x1f4   : > { %v711_v8 = vadd.f32 %v1085_v6, %v695_v4 }
 0x1f5   : > { %1086 = vtanh.f32 %v637_v7 }
 0x1f6   : > { %775 = vst [vmem:[%s1375_s15 + $0x48] sm:$0xff] %v711_v8 }
 0x1fa   : > { %v639_v10 = vpop.f32.mrf.mxu2 }
 0x1fb   : > { %v1087_v11 = vpop.eup %1086  ;;  %v640_v12 = vadd.f32 %v1384_v9, %v639_v10 }
 0x1fc   : > { %v712_v13 = vadd.f32 %v1087_v11, %v696_v62 }
 0x1fd   : > { %1088 = vtanh.f32 %v640_v12 }
 0x1fe   : > { %776 = vst [vmem:[%s1375_s15 + $0x50] sm:$0xff] %v712_v13 }
 0x203   : > { %v1089_v15 = vpop.eup %1088 }
 0x204   : > { %v713_v16 = vadd.f32 %v1089_v15, %v697_v14 }
 0x206   : > { %777 = vst [vmem:[%s1375_s15 + $0x58] sm:$0xff] %v713_v16 }
 0x207   : > { %s990_s17 = sshll.u32 %s1184_s22, 7  ;;  %s822_s23 = sshll.u32 %s1375_s15, 4  ;;  %s823_s23 = int_to_ptr.vmem [resolvable:$true] %s822_s23 }
 0x208   : > { %s811_s30 = scalar_lea.hbm %s1508_s5, %s990_s17  ;;  %s1126_s7 = smov 2048  }
 0x209   : > { %s824_s6 = sshll.u32 %s811_s30, 4  ;;  %1003 = sst [smem:[#allocation5]] (%p1201_p5), %s1126_s7  ;;  %s825_s6 = int_to_ptr.hbm [resolvable:$true] %s824_s6 }
 0x20a   : > { %s1127_s8 = smov 4096   ;;  %s1128_s10 = smov 16  }
 0x20b   : > { %1004 = sst [smem:[#allocation5 + $0x1]] (%p1201_p5), %s1127_s8  ;;  %s1129_s22 = smov 128  }
 0x20c   : > { %1005 = sst [smem:[#allocation5 + $0x2]] (%p1201_p5), %s1128_s10  ;;  %s1130_s11 = smov 8  }
 0x20d   : > { %1006 = sst [smem:[#allocation5 + $0x3]] (%p1201_p5), %s1129_s22  ;;  %s1131_s12 = smov [#allocation4]  }
 0x20e   : > { %1007 = sst [smem:[#allocation5 + $0x4]] (%p1201_p5), %s1129_s22  ;;  %s1132_s13 = smov 0  }
 0x20f   : > { %1008 = sst [smem:[#allocation5 + $0x5]] (%p1201_p5), %s1130_s11 }
 0x210   : > { %1009 = dma.general (%p1201_p5), %s823_s23, 4096, %s825_s6, %s800_s16, %s1131_s12, [#allocation5], %s1132_s13, 0  }
 0x211 PF: > { %p1015_p11 = scmp.ge.s32.totalorder %s1124_s21, 2  ;;  %s852_s15 = sand.u32 1, %s1112_s18  }
 0x212   : > { %s853_s9 = scalar_lea.sflag [#allocation3], %s852_s15 }
 0x213   : > { %p1012_p12 = pnand %p1015_p11, %p1205_p6 }
 0x215   : > { %p1013_p13 = pneg %p1012_p12 }
 0x217   : > { %1107 = dma.done.wait (%p1013_p13), %s853_s9, 4096  }
 0x218   : > { %1109 = vsyncadd (%p1013_p13), %s853_s9, 4294963200  ;;  %p15_p0 = scmp.ge.s32.totalorder %s1188_s24, 4   ;;  %s1511_s18 = smov %s1116_s19 }
 0x219   : > { %s1512_s19 = smov %s1120_s20  ;;  %s1513_s20 = smov %s1199_s27 }
 0x21a   : > { %s1514_s21 = smov %s1188_s24  ;;  %17 = sbr.rel (!%p15_p0) target bundleno = 3 (0x3), region = 84 }
 0x21f   :  { %859 = vsyncpa [#allocation3], 1 }
 0x220   :  { %861 = vsyncpa [#allocation3 + $0x1], 1 }

</bundles_post_ra>
